<compile_context>
chip_gen: v7x
topology: tpu7x:2x2x1
jax: 0.10.0
libtpu: 0.0.40
codegen_flags: <defaults>
</compile_context>

<pallas_src>
import functools

import jax
import jax.numpy as jnp
import numpy as np
from jax.experimental import pallas as pl
from jax.experimental.pallas import tpu as pltpu


# ----------------------------------------------------------------------------
# Helpers
# ----------------------------------------------------------------------------
def _round_up(x, m):
    return (x + m - 1) // m * m


def _tile_limits():
    """Per-generation tile caps (tm_max, tk_max)."""
    try:
        kind = jax.devices()[0].device_kind.lower()
    except Exception:
        kind = ""
    if "v5" in kind:
        # v5e: 4x128x128 MXU, 16 MiB scoped-VMEM default -> smaller tiles.
        return 128, 1024
    # v6e / v7x: 256-wide MXU; tiles sized to stay well under VMEM defaults.
    return 256, 2048


_TM_MAX, _TK_MAX = _tile_limits()


def _apply_act(y, act):
    if act == "leaky":
        return jnp.where(y >= 0.0, y, 0.2 * y)
    if act == "sigmoid":
        return jax.nn.sigmoid(y)
    return y


# ----------------------------------------------------------------------------
# Fused (X @ W) * scale + bias -> activation  Pallas kernels
# ----------------------------------------------------------------------------
def _fused_matmul_kernel_1k(x_ref, w_ref, s_ref, b_ref, o_ref, *, act):
    # Entire K fits in one block: no accumulator loop needed.
    y = jnp.dot(x_ref[...], w_ref[...], preferred_element_type=jnp.float32)
    y = y * s_ref[...] + b_ref[...]
    o_ref[...] = _apply_act(y, act).astype(o_ref.dtype)


def _fused_matmul_kernel_nk(x_ref, w_ref, s_ref, b_ref, o_ref, acc_ref, *, act):
    k = pl.program_id(2)

    @pl.when(k == 0)
    def _():
        acc_ref[...] = jnp.zeros_like(acc_ref)

    acc_ref[...] += jnp.dot(x_ref[...], w_ref[...],
                            preferred_element_type=jnp.float32)

    @pl.when(k == pl.num_programs(2) - 1)
    def _():
        y = acc_ref[...] * s_ref[...] + b_ref[...]
        o_ref[...] = _apply_act(y, act).astype(o_ref.dtype)


def fused_matmul(x, w, scale, bias, act, out_dtype=jnp.float32):
    """out = act((x @ w) * scale + bias); bf16 operands, f32 accumulation."""
    M, K = x.shape
    K2, N = w.shape
    assert K == K2

    # ---- tile selection -----------------------------------------------
    tm = min(_TM_MAX, _round_up(M, 8))
    Mp = _round_up(M, tm)

    nk = -(-K // _TK_MAX)                        # number of K blocks
    tk = _round_up(-(-K // nk), 128)             # lane-aligned per-block K
    Kp = tk * nk

    Np = _round_up(N, 128)                       # lane-dense output stores
    tn = next(t for t in (512, 256, 128) if Np % t == 0)

    # ---- bf16 inputs + zero padding (padded rows/cols contribute 0) ----
    xb = x.astype(jnp.bfloat16)
    wb = w.astype(jnp.bfloat16)
    if (Mp, Kp) != (M, K):
        xb = jnp.pad(xb, ((0, Mp - M), (0, Kp - K)))
    if (Kp, Np) != (K, N):
        wb = jnp.pad(wb, ((0, Kp - K), (0, Np - N)))
    s2 = jnp.pad(scale.reshape(1, N).astype(jnp.float32),
                 ((0, 0), (0, Np - N)))
    b2 = jnp.pad(bias.reshape(1, N).astype(jnp.float32),
                 ((0, 0), (0, Np - N)))

    if nk == 1:
        kernel = functools.partial(_fused_matmul_kernel_1k, act=act)
        grid = (Mp // tm, Np // tn)
        in_specs = [
            pl.BlockSpec((tm, tk), lambda i, j: (i, 0)),
            pl.BlockSpec((tk, tn), lambda i, j: (0, j)),
            pl.BlockSpec((1, tn), lambda i, j: (0, j)),
            pl.BlockSpec((1, tn), lambda i, j: (0, j)),
        ]
        out_spec = pl.BlockSpec((tm, tn), lambda i, j: (i, j))
        scratch = []
        sem = ("parallel", "parallel")
    else:
        kernel = functools.partial(_fused_matmul_kernel_nk, act=act)
        grid = (Mp // tm, Np // tn, nk)
        in_specs = [
            pl.BlockSpec((tm, tk), lambda i, j, k: (i, k)),
            pl.BlockSpec((tk, tn), lambda i, j, k: (k, j)),
            pl.BlockSpec((1, tn), lambda i, j, k: (0, j)),
            pl.BlockSpec((1, tn), lambda i, j, k: (0, j)),
        ]
        out_spec = pl.BlockSpec((tm, tn), lambda i, j, k: (i, j))
        scratch = [pltpu.VMEM((tm, tn), jnp.float32)]
        sem = ("parallel", "parallel", "arbitrary")

    out = pl.pallas_call(
        kernel,
        out_shape=jax.ShapeDtypeStruct((Mp, Np), out_dtype),
        grid_spec=pltpu.PrefetchScalarGridSpec(
            num_scalar_prefetch=0,
            grid=grid,
            in_specs=in_specs,
            out_specs=out_spec,
            scratch_shapes=scratch,
        ),
        compiler_params=pltpu.CompilerParams(dimension_semantics=sem),
    )(xb, wb, s2, b2)
    return out[:M, :N]


# ----------------------------------------------------------------------------
# Conv 3x3 (pad=1) as im2col + fused Pallas matmul (bf16 activations out)
# ----------------------------------------------------------------------------
def _extract_patches(x_nhwc, stride):
    n, h, w, c = x_nhwc.shape
    ho = (h + 2 - 3) // stride + 1
    wo = (w + 2 - 3) // stride + 1
    xp = jnp.pad(x_nhwc, ((0, 0), (1, 1), (1, 1), (0, 0)))
    cols = []
    for kh in range(3):
        for kw in range(3):
            sl = xp[:,
                    kh:kh + stride * (ho - 1) + 1:stride,
                    kw:kw + stride * (wo - 1) + 1:stride, :]
            cols.append(sl)
    patches = jnp.concatenate(cols, axis=-1)          # (n, ho, wo, 9*c)
    return patches.reshape(n * ho * wo, 9 * c), (n, ho, wo)


def conv_bn_lrelu(x_nhwc, w_hwio, scale, bias, stride):
    patches, (n, ho, wo) = _extract_patches(x_nhwc, stride)
    w2 = w_hwio.reshape(-1, w_hwio.shape[-1])         # (9*Cin, Cout), (kh,kw,c)
    y = fused_matmul(patches, w2, scale, bias, act="leaky",
                     out_dtype=jnp.bfloat16)
    return y.reshape(n, ho, wo, -1)


# ----------------------------------------------------------------------------
# AdaptiveAvgPool2d((14,14)) folded into the FC1 weight (exact, linear algebra)
# ----------------------------------------------------------------------------
def _adaptive_pool_matrix(in_size, out_size):
    p = np.zeros((out_size, in_size), np.float32)
    for i in range(out_size):
        start = (i * in_size) // out_size
        end = -(-((i + 1) * in_size) // out_size)
        p[i, start:end] = 1.0 / (end - start)
    return jnp.asarray(p)


def fold_pool_into_fc1(fc1_w, h_pre, w_pre, channels, pooled_hw=(14, 14)):
    """W_eff[(h,w,c), j] = sum_{p,q} P_h[p,h] P_w[q,w] fc1_w[(c,p,q), j].

    Feeding the NHWC pre-pool feature map (flattened as (h,w,c)) through W_eff
    is exactly AdaptiveAvgPool2d((14,14)) + NCHW flatten + Linear.
    In a real deployment this fold is precomputed once per input size.
    """
    ph = _adaptive_pool_matrix(h_pre, pooled_hw[0])   # (14, h_pre)
    pw = _adaptive_pool_matrix(w_pre, pooled_hw[1])   # (14, w_pre)
    w_r = fc1_w.reshape(channels, pooled_hw[0], pooled_hw[1], fc1_w.shape[-1])
    w_eff = jnp.einsum("ph,qw,cpqj->hwcj", ph, pw, w_r)
    return w_eff.reshape(h_pre * w_pre * channels, fc1_w.shape[-1])


# ----------------------------------------------------------------------------
# Parameter construction (deterministic, synthetic)
# ----------------------------------------------------------------------------
_LAYER_CFG = [
    # (c_in, c_out, stride, has_bn)
    (3, 64, 1, False),
    (64, 64, 2, True),
    (64, 128, 1, True),
    (128, 128, 2, True),
    (128, 256, 1, True),
    (256, 256, 2, True),
    (256, 512, 1, True),
    (512, 512, 2, True),
]
_BN_EPS = 1e-5


def init_params(key):
    params = {"convs": []}
    for (c_in, c_out, stride, has_bn) in _LAYER_CFG:
        key, kw, kg, kb, km, kv = jax.random.split(key, 6)
        w = jax.random.normal(kw, (3, 3, c_in, c_out), jnp.float32) * 0.05
        if has_bn:
            gamma = 1.0 + 0.1 * jax.random.normal(kg, (c_out,), jnp.float32)
            beta = 0.1 * jax.random.normal(kb, (c_out,), jnp.float32)
            rmean = 0.1 * jax.random.normal(km, (c_out,), jnp.float32)
            rvar = jnp.abs(jax.random.normal(kv, (c_out,), jnp.float32)) + 0.5
            scale = gamma / jnp.sqrt(rvar + _BN_EPS)
            bias = beta - rmean * scale
        else:
            # Conv2d(bias=False) and no BN -> identity affine.
            scale = jnp.ones((c_out,), jnp.float32)
            bias = jnp.zeros((c_out,), jnp.float32)
        params["convs"].append(dict(w=w, scale=scale, bias=bias, stride=stride))

    feat_dim = 512 * 14 * 14
    key, k1, k2, k3, k4 = jax.random.split(key, 5)
    params["fc1_w"] = jax.random.normal(k1, (feat_dim, 1024), jnp.float32) * 1e-3
    params["fc1_b"] = 0.01 * jax.random.normal(k2, (1024,), jnp.float32)
    params["fc2_w"] = jax.random.normal(k3, (1024, 1), jnp.float32) * 1e-2
    params["fc2_b"] = 0.01 * jax.random.normal(k4, (1,), jnp.float32)
    return params


# ----------------------------------------------------------------------------
# Full forward pass
# ----------------------------------------------------------------------------
def discriminator_forward(params, x_nchw):
    x = jnp.transpose(x_nchw, (0, 2, 3, 1))  # NCHW -> NHWC (internal layout)
    for layer in params["convs"]:
        x = conv_bn_lrelu(x, layer["w"], layer["scale"], layer["bias"],
                          layer["stride"])

    n, h, w, c = x.shape
    # AdaptiveAvgPool2d + flatten + Linear folded into one fused matmul.
    w_eff = fold_pool_into_fc1(params["fc1_w"], h, w, c)
    x = x.reshape(n, h * w * c)

    ones = jnp.ones((1024,), jnp.float32)
    x = fused_matmul(x, w_eff, ones, params["fc1_b"], act="leaky",
                     out_dtype=jnp.bfloat16)
    one = jnp.ones((1,), jnp.float32)
    x = fused_matmul(x, params["fc2_w"], one, params["fc2_b"], act="sigmoid",
                     out_dtype=jnp.float32)
    return x                                           # (N, 1)


if __name__ == "__main__":
    key = jax.random.PRNGKey(0)
    key, kin = jax.random.split(key)
    # Small deterministic input: batch=2, 3 channels, 32x32 spatial (NCHW).
    x = jax.random.normal(kin, (2, 3, 32, 32), jnp.float32)

    params = init_params(key)
    out = discriminator_forward(params, x)
    out = jax.block_until_ready(out)

    assert out.shape == (2, 1), out.shape
    assert bool(jnp.all(jnp.isfinite(out)))
    assert bool(jnp.all((out >= 0.0) & (out <= 1.0)))  # sigmoid range
    print("KERNEL_OK")
</pallas_src>

<mosaic_0001>
module attributes {stable_mosaic.version = 11 : i64} {
  func.func @_fused_matmul_kernel_1k(%arg0: i32, %arg1: i32, %arg2: memref<256x128xbf16, #tpu.memory_space<vmem>>, %arg3: memref<128x128xbf16, #tpu.memory_space<vmem>>, %arg4: memref<1x128xf32, #tpu.memory_space<vmem>>, %arg5: memref<1x128xf32, #tpu.memory_space<vmem>>, %arg6: memref<256x128xbf16, #tpu.memory_space<vmem>>) attributes {dimension_semantics = [#tpu.dimension_semantics<parallel>, #tpu.dimension_semantics<parallel>], iteration_bounds = array<i64: 8, 1>, scalar_prefetch = 0 : i64, scratch_operands = 0 : i64, tpu.core_type = #tpu.core_type<tc>, window_params = [{transform_indices = @transform_0, window_bounds = array<i64: 256, 128>}, {transform_indices = @transform_1, window_bounds = array<i64: 128, 128>}, {transform_indices = @transform_2, window_bounds = array<i64: 1, 128>}, {transform_indices = @transform_3, window_bounds = array<i64: 1, 128>}, {transform_indices = @transform_4, window_bounds = array<i64: 256, 128>}]} {
    %c0 = arith.constant 0 : index
    %c0_0 = arith.constant 0 : index
    %0 = vector.load %arg2[%c0, %c0_0] : memref<256x128xbf16, #tpu.memory_space<vmem>>, vector<256x128xbf16>
    %c0_1 = arith.constant 0 : index
    %c0_2 = arith.constant 0 : index
    %1 = vector.load %arg3[%c0_1, %c0_2] : memref<128x128xbf16, #tpu.memory_space<vmem>>, vector<128x128xbf16>
    %cst = arith.constant dense<0.000000e+00> : vector<256x128xf32>
    %2 = tpu.matmul %0, %1, %cst {dimension_numbers = #tpu.dot_dimension_numbers<[1], [0], [0], [1], [0, 0, 1, 1], [], []>} : vector<256x128xbf16>, vector<128x128xbf16>, vector<256x128xf32> -> vector<256x128xf32>
    %c0_3 = arith.constant 0 : index
    %c0_4 = arith.constant 0 : index
    %3 = vector.load %arg4[%c0_3, %c0_4] : memref<1x128xf32, #tpu.memory_space<vmem>>, vector<1x128xf32>
    %4 = vector.broadcast %3 : vector<1x128xf32> to vector<256x128xf32>
    %5 = arith.mulf %2, %4 : vector<256x128xf32>
    %c0_5 = arith.constant 0 : index
    %c0_6 = arith.constant 0 : index
    %6 = vector.load %arg5[%c0_5, %c0_6] : memref<1x128xf32, #tpu.memory_space<vmem>>, vector<1x128xf32>
    %7 = vector.broadcast %6 : vector<1x128xf32> to vector<256x128xf32>
    %8 = arith.addf %5, %7 : vector<256x128xf32>
    %cst_7 = arith.constant 0.000000e+00 : f32
    %9 = vector.broadcast %cst_7 : f32 to vector<256x128xf32>
    %10 = arith.cmpf oge, %8, %9 : vector<256x128xf32>
    %cst_8 = arith.constant 2.000000e-01 : f32
    %11 = vector.broadcast %cst_8 : f32 to vector<256x128xf32>
    %12 = arith.mulf %11, %8 : vector<256x128xf32>
    %13 = arith.select %10, %8, %12 : vector<256x128xi1>, vector<256x128xf32>
    %14 = arith.truncf %13 : vector<256x128xf32> to vector<256x128xbf16>
    %c0_9 = arith.constant 0 : index
    %c0_10 = arith.constant 0 : index
    %15 = vector.load %arg6[%c0_9, %c0_10] : memref<256x128xbf16, #tpu.memory_space<vmem>>, vector<256x128xbf16>
    tpu.vector_store %arg6[%c0_9, %c0_10], %14 {strides = array<i32>} : memref<256x128xbf16, #tpu.memory_space<vmem>>, vector<256x128xbf16>,
    return
  }
  func.func @transform_0(%arg0: i32, %arg1: i32) -> (i32, i32) {
    %c0_i32 = arith.constant 0 : i32
    %c0_i32_0 = arith.constant 0 : i32
    return %arg0, %c0_i32 : i32, i32
  }
  func.func @transform_1(%arg0: i32, %arg1: i32) -> (i32, i32) {
    %c0_i32 = arith.constant 0 : i32
    %c0_i32_0 = arith.constant 0 : i32
    return %c0_i32, %arg1 : i32, i32
  }
  func.func @transform_2(%arg0: i32, %arg1: i32) -> (i32, i32) {
    %c0_i32 = arith.constant 0 : i32
    %c0_i32_0 = arith.constant 0 : i32
    return %c0_i32, %arg1 : i32, i32
  }
  func.func @transform_3(%arg0: i32, %arg1: i32) -> (i32, i32) {
    %c0_i32 = arith.constant 0 : i32
    %c0_i32_0 = arith.constant 0 : i32
    return %c0_i32, %arg1 : i32, i32
  }
  func.func @transform_4(%arg0: i32, %arg1: i32) -> (i32, i32) {
    %c0_i32 = arith.constant 0 : i32
    return %arg0, %arg1 : i32, i32
  }
}

</mosaic_0001>

<bundles_post_ra>
// kernel: tpu_custom_call.1
= control target key start
LH: loop header
LB: loop body
LE: loop exit
PB: predicated region body
PF: predicated region fallthrough
CT: control target
= control target key end

     0   :  { %9 = vsyncpa [#allocation3], 0  ;;  %s2018_s0 = inlined_call_operand.hbm [shape: bf16[2048,128], index: 0, kind: input, shape index: {}]   ;;  %s2019_s1 = inlined_call_operand.hbm [shape: bf16[128,128], index: 1, kind: input, shape index: {}]   ;;  %s2020_s2 = inlined_call_operand.vmem [shape: f32[1,128], index: 2, kind: input, shape index: {}]   ;;  %s2021_s3 = inlined_call_operand.vmem [shape: f32[1,128], index: 3, kind: input, shape index: {}]   ;;  %s2022_s4 = inlined_call_operand.hbm [shape: bf16[2048,128], index: 4, kind: output, shape index: {}]  }
   0x1   :  { %11 = vsyncpa [#allocation3 + $0x1], 0 }
   0x2   :  { %12 = vsyncpa [#allocation6], 0 }
   0x3   :  { %13 = vsyncpa [#allocation4], 0 }
   0x4   :  { %15 = vsyncpa [#allocation4 + $0x1], 0  ;;  %s1677_s15 = smov 0   ;;  %s1679_s16 = smov 0  }
   0x5   :  { %s1681_s17 = smov 0   ;;  %s1683_s18 = smov 0  }
   0x6   :  { %s1685_s19 = smov 0   ;;  %s1687_s20 = smov 0  }
   0x7 LB: > { %s1104_s21 = sadd.s32 4294967295, %s1643_s20   ;;  %s1105_s22 = sadd.s32 4294967294, %s1643_s20   ;;  %s1643_s20 = sphi %s1687_s20, %s21_s20   ;;  %s1639_s19 = sphi %s1685_s19, %s2045_s19   ;;  %s1635_s18 = sphi %s1683_s18, %s2044_s18   ;;  %s1631_s17 = sphi %s1681_s17, %s2043_s17   ;;  %s1627_s16 = sphi %s1679_s16, %s2042_s16   ;;  %s1623_s15 = sphi %s1677_s15, %s2041_s15  }
   0x8   : > { %p53_p0 = scmp.ne.s32.totalorder %s1627_s16, %s1623_s15  ;;  %p1711_p1 = scmp.eq.s32.totalorder %s1104_s21, 0 }
   0x9   : > { %p1715_p2 = scmp.eq.s32.totalorder %s1104_s21, 7  ;;  %p163_p3 = scmp.eq.s32.totalorder %s1105_s22, 7 }
   0xa   : > { %s2027_s23 = scalar_select %p1711_p1, 1, 0 }
   0xb   : > { %s2028_s24 = scalar_select %p1715_p2, 1, 0 }
   0xc   : > { %p1721_p4 = por %p1711_p1, %p53_p0  ;;  %p1106_p5 = scmp.ge.s32.totalorder %s1643_s20, 1 }
   0xd   : > { %p1726_p6 = por %p163_p3, %p53_p0  ;;  %p170_p7 = scmp.lt.s32.totalorder %s1643_s20, 9 }
   0xe   : > { %s2029_s25 = scalar_select %p1721_p4, 1, 0 }
   0xf   : > { %s2030_s26 = scalar_select %p1726_p6, 1, 0 }
  0x10   : > { %p1731_p8 = pnand %p1106_p5, %p170_p7  ;;  %s1645_s28 = smov [#allocation5]  }
  0x11   : > { %s184_s29 = sshll.u32 %s1645_s28, 4  ;;  %s33_s5 = sadd.s32 1, %s1639_s19  ;;  %s185_s29 = int_to_ptr.vmem [resolvable:$true] %s184_s29 }
  0x12   : > { %s2031_s27 = scalar_select %p1731_p8, 1, 0 }
  0x13   : > { %p1406_p9 = pneg %p1731_p8  ;;  %s1499_s8 = scalar_lea.hbm %s2019_s1, 1024 }
  0x14   : > { %p1500_p11 = scmp.ne.s32.totalorder %s2019_s1, %s1499_s8  ;;  %p1506_p3 = scmp.lt.u32.totalorder %s1499_s8, %s2019_s1 }
  0x15   : > { %p1739_p10 = pnand %p1406_p9, %p1711_p1 }
  0x17   : > { %p1501_p12 = pneg %p1739_p10 }
  0x19   : > { %p1502_p13 = pnand %p1501_p12, %p1500_p11 }
  0x1b   : > { %p1503_p0 = pneg %p1502_p13 }
  0x1d   : > { %p1508_p5 = pnand %p1506_p3, %p1503_p0 }
  0x1f   : > { %1511 = shalt.err (!%p1508_p5)
}
  0x20   : > { %s1512_s13 = scalar_lea.vmem %s185_s29, 1024  ;;  %p1520_p1 = scmp.lt.s32.totalorder %s185_s29, %s185_s29 }
  0x21   : > { %p1513_p7 = scmp.ne.s32.totalorder %s185_s29, %s1512_s13  ;;  %p1521_p4 = scmp.lt.s32.totalorder %s1512_s13, %s1512_s13 }
  0x23   : > { %p1515_p9 = pnand %p1513_p7, %p1501_p12  ;;  %p1522_p8 = por %p1521_p4, %p1520_p1 }
  0x25   : > { %p1516_p6 = pneg %p1515_p9 }
  0x27   : > { %p1523_p2 = pnand %p1522_p8, %p1516_p6 }
  0x29   : > { %1526 = shalt.err (!%p1523_p2)
}
  0x2a   : > { %s1646_s14 = smov 64   ;;  %s1647_s21 = smov 4  }
  0x2b   : > { %1409 = dma.hbm_to_vmem [thread:$0]  (!%p1739_p10), %s2019_s1, 1024, %s185_s29, [#allocation6], %s1646_s14, %s1646_s14, %s1647_s21  }
  0x2c   : > { %p35_p1 = scmp.ge.s32.totalorder %s33_s5, 8  ;;  %s40_s6 = sadd.s32 1, %s1631_s17 }
  0x2d   : > { %p47_p2 = scmp.ne.s32.totalorder %s1631_s17, %s1627_s16  ;;  %p48_p4 = scmp.eq.s32.totalorder %s1643_s20, 0 }
  0x2e   : > { %s2047_s5 = smov (%p35_p1, %s33_s5), 0  ;;  %p2034_p8 = scmp.ne.s32.totalorder %s2028_s24, 0 }
  0x2f   : > { %p1769_p6 = por %p48_p4, %p47_p2  ;;  %s37_s8 = ssub.s32 %s1639_s19, %s2047_s5 }
  0x30   : > { %p1775_p11 = por %p2034_p8, %p47_p2  ;;  %p1419_p12 = scmp.lt.s32.totalorder %s1643_s20, 8 }
  0x31   : > { %p38_p10 = scmp.eq.s32.totalorder %s37_s8, 0  ;;  %s210_s29 = sand.u32 1, %s1631_s17  }
  0x32   : > { %s1111_s9 = sshll.u32 %s210_s29, 7  ;;  %s1181_s11 = sshll.u32 %s1639_s19, 11 }
  0x33   : > { %s1784_s10 = scalar_select %p38_p10, %s1631_s17, %s40_s6  }
  0x34   : > { %s1790_s22 = scalar_lea.hbm %s2018_s0, %s1181_s11  ;;  %s214_s24 = scalar_lea.vmem [#allocation2], %s1111_s9 }
  0x35   : > { %s221_s28 = sshll.u32 %s214_s24, 4  ;;  %p1796_p13 = pnand %p1419_p12, %p1769_p6  ;;  %s1792_s28 = int_to_ptr.vmem [resolvable:$true] %s221_s28 }
  0x36   : > { %s1800_s6 = scalar_lea.sflag [#allocation3], %s210_s29  ;;  %s1527_s12 = scalar_lea.hbm %s1790_s22, 2048 }
  0x37   : > { %p1528_p0 = scmp.ne.s32.totalorder %s1790_s22, %s1527_s12  ;;  %p1529_p3 = pneg %p1796_p13 }
  0x38   : > { %s1532_s7 = scalar_lea.hbm %s2018_s0, 16384  ;;  %p1533_p9 = scmp.lt.u32.totalorder %s1790_s22, %s2018_s0 }
  0x39   : > { %p1530_p5 = pnand %p1529_p3, %p1528_p0  ;;  %p1534_p1 = scmp.lt.u32.totalorder %s1532_s7, %s1527_s12 }
  0x3a   : > { %p1536_p4 = scmp.lt.u32.totalorder %s1527_s12, %s1790_s22 }
  0x3b   : > { %p1531_p7 = pneg %p1530_p5  ;;  %p1535_p2 = por %p1534_p1, %p1533_p9 }
  0x3d   : > { %p1537_p6 = por %p1536_p4, %p1535_p2 }
  0x3f   : > { %p1538_p8 = pnand %p1537_p6, %p1531_p7 }
  0x41   : > { %1541 = shalt.err (!%p1538_p8)
}
  0x42   : > { %s1542_s29 = scalar_lea.vmem %s1792_s28, 2048  ;;  %s1648_s9 = smov [#allocation2]  }
  0x43   : > { %p1543_p12 = scmp.ne.s32.totalorder %s1792_s28, %s1542_s29  ;;  %s1547_s11 = sshll.u32 %s1648_s9, 4  ;;  %s1548_s11 = int_to_ptr.vmem [resolvable:$false] %s1547_s11 }
  0x44   : > { %s1549_s13 = scalar_lea.vmem %s1548_s11, 4096  ;;  %p1550_p5 = scmp.lt.s32.totalorder %s1792_s28, %s1548_s11 }
  0x45   : > { %p1545_p10 = pnand %p1543_p12, %p1529_p3  ;;  %p1551_p9 = scmp.lt.s32.totalorder %s1549_s13, %s1542_s29 }
  0x47   : > { %p1546_p0 = pneg %p1545_p10  ;;  %p1552_p1 = por %p1551_p9, %p1550_p5 }
  0x49   : > { %p1553_p2 = pnand %p1552_p1, %p1546_p0 }
  0x4b   : > { %1556 = shalt.err (!%p1553_p2)
}
  0x4c   : > { %1413 = dma.hbm_to_vmem [thread:$0]  (!%p1796_p13), %s1790_s22, 2048, %s1792_s28, %s1800_s6, %s1646_s14, %s1646_s14, %s1647_s21  }
  0x4d   : > { %p2037_p3 = scmp.ne.s32.totalorder %s2031_s27, 0 }
  0x4e   : > { %s1834_s12 = sand.u32 (!%p2037_p3), 1, %s1627_s16   ;;  %p2038_p7 = scmp.ne.s32.totalorder (!%p2037_p3), %s2029_s25, 0 }
  0x4f   : > { %233 = sbr.rel (%p2037_p3) target bundleno = 399 (0x18f), region = 36  ;;  %s1115_s7 = sshll.u32 (!%p2037_p3), %s1834_s12, 7 }
  0x50   : > { %s236_s24 = scalar_lea.sflag (!%p2037_p3), [#allocation3], %s1834_s12  ;;  %s1840_s8 = scalar_lea.vmem (!%p2037_p3), [#allocation2], %s1115_s7 }
  0x56   : > { %1610 = dma.done.wait (%p2038_p7), %s236_s24, 2048  }
  0x57   : > { %1612 = vsyncadd (%p2038_p7), %s236_s24, 4294965248  ;;  %p2039_p13 = scmp.ne.s32.totalorder %s2027_s23, 0 }
  0x59   : > { %1614 = dma.done.wait (%p2039_p13), [#allocation6], 1024  }
  0x5a   : > { %1616 = vsyncadd (%p2039_p13), [#allocation6], 4294966272  ;;  %v1475_v0 = vld [vmem:[#allocation5] sm:$0xff]   ;;  %v1476_v1 = vld [vmem:[#allocation5 + $0x8] sm:$0xff]   ;;  %s1898_s21 = scalar_lea.vmem [#allocation7], %s1115_s7  ;;  %s1214_s22 = sshll.u32 %s1635_s18, 11 }
  0x5b   : > { %1334 = vmatprep.subr.bf16.mxu0 %v1475_v0  ;;  %1382 = vmatprep.subr.bf16.mxu1 %v1475_v0  ;;  %v1477_v2 = vld [vmem:[#allocation5 + $0x10] sm:$0xff]   ;;  %v1478_v3 = vld [vmem:[#allocation5 + $0x18] sm:$0xff]   ;;  %v1483_v4 = vld [vmem:[%s1840_s8] sm:$0xff]   ;;  %s985_s28 = sshll.u32 %s1898_s21, 4  ;;  %s1966_s9 = scalar_lea.hbm %s2022_s4, %s1214_s22  ;;  %s1968_s28 = int_to_ptr.vmem [resolvable:$true] %s985_s28 }
  0x5c   : > { %1335 = vmatpush3.bf16.msra.mxu0 %v1475_v0  ;;  %1390 = vmatpush3.bf16.msra.mxu1 %v1475_v0  ;;  %v1484_v5 = vld [vmem:[%s1840_s8 + $0x40] sm:$0xff]   ;;  %v1480_v7 = vld [vmem:[#allocation5 + $0x28] sm:$0xff]   ;;  %v1481_v8 = vld [vmem:[#allocation5 + $0x30] sm:$0xff]   ;;  %s971_s18 = scalar_lea.sflag [#allocation4], %s1834_s12  ;;  %s1557_s11 = scalar_lea.vmem %s1968_s28, 2048 }
  0x5d   : > { %1336 = vmatprep.subr.bf16.mxu0 %v1476_v1  ;;  %1383 = vmatprep.subr.bf16.mxu1 %v1476_v1  ;;  %v1479_v6 = vld [vmem:[#allocation5 + $0x20] sm:$0xff]   ;;  %v1482_v9 = vld [vmem:[#allocation5 + $0x38] sm:$0xff]   ;;  %v1485_v10 = vld [vmem:[%s1840_s8 + $0x8] sm:$0xff]   ;;  %p1558_p4 = scmp.ne.s32.totalorder %s1968_s28, %s1557_s11  ;;  %s1649_s13 = smov [#allocation7]  }
  0x5e   : > { %1350 = vmatprep.mubr.bf16.mxu0 %v1483_v4  ;;  %1366 = vmatprep.mubr.bf16.mxu1 %v1484_v5  ;;  %v1486_v11 = vld [vmem:[%s1840_s8 + $0x48] sm:$0xff]   ;;  %v1487_v12 = vld [vmem:[%s1840_s8 + $0x10] sm:$0xff]   ;;  %v1489_v14 = vld [vmem:[%s1840_s8 + $0x18] sm:$0xff]   ;;  %s1561_s7 = sshll.u32 %s1649_s13, 4  ;;  %s1562_s7 = int_to_ptr.vmem [resolvable:$false] %s1561_s7 }
  0x5f   : > { %v1488_v13 = vld [vmem:[%s1840_s8 + $0x50] sm:$0xff]   ;;  %v1490_v15 = vld [vmem:[%s1840_s8 + $0x58] sm:$0xff]   ;;  %v1491_v16 = vld [vmem:[%s1840_s8 + $0x20] sm:$0xff]   ;;  %p1559_p6 = pnand %p1558_p4, %p1775_p11  ;;  %s1563_s24 = scalar_lea.vmem %s1562_s7, 4096 }
  0x60   : > { %1337 = vmatpush3.bf16.msra.mxu0 %v1476_v1  ;;  %1391 = vmatpush3.bf16.msra.mxu1 %v1476_v1  ;;  %v1492_v17 = vld [vmem:[%s1840_s8 + $0x60] sm:$0xff]   ;;  %v1493_v18 = vld [vmem:[%s1840_s8 + $0x28] sm:$0xff]   ;;  %v1495_v20 = vld [vmem:[%s1840_s8 + $0x30] sm:$0xff]   ;;  %p1564_p12 = scmp.lt.s32.totalorder %s1968_s28, %s1562_s7  ;;  %p1565_p10 = scmp.lt.s32.totalorder %s1563_s24, %s1557_s11 }
  0x61   : > { %1338 = vmatprep.subr.bf16.mxu0 %v1477_v2  ;;  %1384 = vmatprep.subr.bf16.mxu1 %v1477_v2  ;;  %v1494_v19 = vld [vmem:[%s1840_s8 + $0x68] sm:$0xff]   ;;  %v1496_v21 = vld [vmem:[%s1840_s8 + $0x70] sm:$0xff]   ;;  %v1497_v22 = vld [vmem:[%s1840_s8 + $0x38] sm:$0xff]   ;;  %p1560_p8 = pneg %p1559_p6 }
  0x62   : > { %v1498_v23 = vld [vmem:[%s1840_s8 + $0x78] sm:$0xff]   ;;  %v1869_v24 = vld [vmem:[%s2020_s2] ss:$0 sm:$0xff]  ;;  %p1566_p0 = por %p1565_p10, %p1564_p12 }
  0x63   : > { %v1874_v26 = vld [vmem:[%s2021_s3] ss:$0 sm:$0xff] }
  0x64   : > { %1339 = vmatpush3.bf16.msra.mxu0 %v1477_v2  ;;  %1392 = vmatpush3.bf16.msra.mxu1 %v1477_v2  ;;  %p1567_p5 = pnand %p1566_p0, %p1560_p8 }
  0x65   : > { %1340 = vmatprep.subr.bf16.mxu0 %v1478_v3  ;;  %1385 = vmatprep.subr.bf16.mxu1 %v1478_v3 }
  0x68   : > { %1341 = vmatpush3.bf16.msra.mxu0 %v1478_v3  ;;  %1393 = vmatpush3.bf16.msra.mxu1 %v1478_v3 }
  0x69   : > { %1342 = vmatprep.subr.bf16.mxu0 %v1479_v6  ;;  %1386 = vmatprep.subr.bf16.mxu1 %v1479_v6 }
  0x6c   : > { %1343 = vmatpush3.bf16.msra.mxu0 %v1479_v6  ;;  %1394 = vmatpush3.bf16.msra.mxu1 %v1479_v6 }
  0x6d   : > { %1344 = vmatprep.subr.bf16.mxu0 %v1480_v7  ;;  %1387 = vmatprep.subr.bf16.mxu1 %v1480_v7 }
  0x70   : > { %1345 = vmatpush3.bf16.msra.mxu0 %v1480_v7  ;;  %1395 = vmatpush3.bf16.msra.mxu1 %v1480_v7 }
  0x71   : > { %1346 = vmatprep.subr.bf16.mxu0 %v1481_v8  ;;  %1388 = vmatprep.subr.bf16.mxu1 %v1481_v8 }
  0x74   : > { %1347 = vmatpush3.bf16.msra.mxu0 %v1481_v8  ;;  %1396 = vmatpush3.bf16.msra.mxu1 %v1481_v8 }
  0x75   : > { %1348 = vmatprep.subr.bf16.mxu0 %v1482_v9  ;;  %1389 = vmatprep.subr.bf16.mxu1 %v1482_v9 }
  0x78   : > { %1349 = vmatpush3.bf16.msra.mxu0 %v1482_v9  ;;  %1397 = vmatpush3.bf16.msra.mxu1 %v1482_v9 }
  0x7b   : > { %1351 = vmatmul.mubr.bf16.vlgmr.msra.gmra.mrb[0].mxu0 %v1485_v10  ;;  %1367 = vmatmul.mubr.bf16.vlgmr.msra.gmra.mrb[0].mxu1 %v1486_v11 }
  0x7c   : > { %1354 = vmatprep.mubr.bf16.mxu0 %v1487_v12  ;;  %1370 = vmatprep.mubr.bf16.mxu1 %v1488_v13 }
  0x83   : > { %1355 = vmatmul.mubr.bf16.gmra.mrb[4].mxu0 %v1489_v14  ;;  %1371 = vmatmul.mubr.bf16.gmra.mrb[4].mxu1 %v1490_v15 }
  0x84   : > { %1358 = vmatprep.mubr.bf16.mxu0 %v1491_v16  ;;  %1374 = vmatprep.mubr.bf16.mxu1 %v1492_v17 }
  0x8b   : > { %1359 = vmatmul.mubr.bf16.gmra.mrb[8].mxu0 %v1493_v18  ;;  %1375 = vmatmul.mubr.bf16.gmra.mrb[8].mxu1 %v1494_v19 }
  0x8c   : > { %1362 = vmatprep.mubr.bf16.mxu0 %v1495_v20  ;;  %1378 = vmatprep.mubr.bf16.mxu1 %v1496_v21 }
  0x93   : > { %1363 = vmatmul.mubr.bf16.gmra.mrb[12].mxu0 %v1497_v22  ;;  %1379 = vmatmul.mubr.bf16.gmra.mrb[12].mxu1 %v1498_v23 }
 0x14e   : > { %v1352_v25 = vpop.f32.mrb[0].mxu0  ;;  %v1368_v27 = vpop.f32.mrb[0].mxu1 }
 0x14f   : > { %v645_v28 = vmul.f32 %v1352_v25, %v1869_v24  ;;  %v661_v29 = vmul.f32 %v1368_v27, %v1869_v24  ;;  %v509_v30 = vpop.f32.mrb[1].mxu0  ;;  %v573_v31 = vpop.f32.mrb[1].mxu1 }
 0x150   : > { %v643_v32 = vmul.f32 %v1869_v24, %v509_v30  ;;  %v659_v33 = vmul.f32 %v1869_v24, %v573_v31  ;;  %v1353_v34 = vpop.f32.mrb[2].mxu0  ;;  %v1369_v35 = vpop.f32.mrb[2].mxu1 }
 0x151   : > { %v684_v36 = vadd.f32 %v1874_v26, %v645_v28  ;;  %v700_v37 = vadd.f32 %v1874_v26, %v661_v29  ;;  %v646_v38 = vmul.f32 %v1353_v34, %v1869_v24  ;;  %v662_v39 = vmul.f32 %v1369_v35, %v1869_v24  ;;  %v512_v40 = vpop.f32.mrb[3].mxu0  ;;  %v576_v41 = vpop.f32.mrb[3].mxu1 }
 0x152   : > { %v682_v42 = vadd.f32 %v1874_v26, %v643_v32  ;;  %v698_v43 = vadd.f32 %v1874_v26, %v659_v33  ;;  %v644_v44 = vmul.f32 %v1869_v24, %v512_v40  ;;  %v660_v45 = vmul.f32 %v1869_v24, %v576_v41 }
 0x153   : > { %vm716_vm0 = vcmp.ge.f32.partialorder %v684_v36, 0.0  ;;  %v748_v46 = vmul.f32 0.2, %v684_v36  ;;  %vm732_vm1 = vcmp.ge.f32.partialorder %v700_v37, 0.0  ;;  %v764_v47 = vmul.f32 0.2, %v700_v37 }
 0x154   : > { %vm714_vm2 = vcmp.ge.f32.partialorder %v682_v42, 0.0  ;;  %v746_v48 = vmul.f32 0.2, %v682_v42  ;;  %vm730_vm3 = vcmp.ge.f32.partialorder %v698_v43, 0.0  ;;  %v762_v49 = vmul.f32 0.2, %v698_v43 }
 0x155   : > { %v780_v50 = vsel %vm716_vm0, %v684_v36, %v748_v46  ;;  %v796_v51 = vsel %vm732_vm1, %v700_v37, %v764_v47  ;;  %v685_v52 = vadd.f32 %v1874_v26, %v646_v38  ;;  %v701_v53 = vadd.f32 %v1874_v26, %v662_v39 }
 0x156   : > { %v778_v54 = vsel %vm714_vm2, %v682_v42, %v746_v48  ;;  %v794_v55 = vsel %vm730_vm3, %v698_v43, %v762_v49  ;;  %v683_v56 = vadd.f32 %v1874_v26, %v644_v44  ;;  %v699_v57 = vadd.f32 %v1874_v26, %v660_v45  ;;  %v1356_v58 = vpop.f32.mrb[4].mxu0  ;;  %v1372_v59 = vpop.f32.mrb[4].mxu1 }
 0x157   : > { %vm717_vm4 = vcmp.ge.f32.partialorder %v685_v52, 0.0  ;;  %v749_v60 = vmul.f32 0.2, %v685_v52  ;;  %vm733_vm5 = vcmp.ge.f32.partialorder %v701_v53, 0.0  ;;  %v765_v61 = vmul.f32 0.2, %v701_v53 }
 0x158   : > { %vm715_vm6 = vcmp.ge.f32.partialorder %v683_v56, 0.0  ;;  %v747_v62 = vmul.f32 0.2, %v683_v56  ;;  %vm731_vm7 = vcmp.ge.f32.partialorder %v699_v57, 0.0  ;;  %v763_v63 = vmul.f32 0.2, %v699_v57 }
 0x159   : > { %v781_v0 = vsel %vm717_vm4, %v685_v52, %v749_v60  ;;  %v797_v1 = vsel %vm733_vm5, %v701_v53, %v765_v61  ;;  %v649_v2 = vmul.f32 %v1356_v58, %v1869_v24  ;;  %v665_v3 = vmul.f32 %v1372_v59, %v1869_v24  ;;  %v525_v4 = vpop.f32.mrb[5].mxu0  ;;  %v589_v5 = vpop.f32.mrb[5].mxu1 }
 0x15a   : > { %v1223_v6 = vpack.c.bf16 %v781_v0, %v780_v50  ;;  %v1263_v7 = vpack.c.bf16 %v797_v1, %v796_v51  ;;  %v779_v8 = vsel %vm715_vm6, %v683_v56, %v747_v62  ;;  %v795_v9 = vsel %vm731_vm7, %v699_v57, %v763_v63  ;;  %v1357_v10 = vpop.f32.mrb[6].mxu0  ;;  %v1373_v11 = vpop.f32.mrb[6].mxu1 }
 0x15b   : > { %v1218_v12 = vpack.c.bf16 %v779_v8, %v778_v54  ;;  %v1258_v13 = vpack.c.bf16 %v795_v9, %v794_v55  ;;  %v688_v14 = vadd.f32 %v1874_v26, %v649_v2  ;;  %v704_v15 = vadd.f32 %v1874_v26, %v665_v3  ;;  %v528_v16 = vpop.f32.mrb[7].mxu0  ;;  %v592_v17 = vpop.f32.mrb[7].mxu1 }
 0x15c   : > { %1295 = vst [vmem:[%s1898_s21 + $0x8] sm:$0xff] %v1223_v6   ;;  %1303 = vst [vmem:[%s1898_s21 + $0x48] sm:$0xff] %v1263_v7   ;;  %v647_v18 = vmul.f32 %v1869_v24, %v525_v4  ;;  %v663_v19 = vmul.f32 %v1869_v24, %v589_v5  ;;  %v650_v20 = vmul.f32 %v1357_v10, %v1869_v24 }
 0x15d   : > { %v666_v21 = vmul.f32 %v1373_v11, %v1869_v24  ;;  %1219 = vst [vmem:[%s1898_s21] sm:$0xff] %v1218_v12   ;;  %1302 = vst [vmem:[%s1898_s21 + $0x40] sm:$0xff] %v1258_v13   ;;  %vm720_vm8 = vcmp.ge.f32.partialorder %v688_v14, 0.0  ;;  %v752_v22 = vmul.f32 0.2, %v688_v14  ;;  %vm736_vm9 = vcmp.ge.f32.partialorder %v704_v15, 0.0 }
 0x15e   : > { %v768_v23 = vmul.f32 0.2, %v704_v15  ;;  %v686_v25 = vadd.f32 %v1874_v26, %v647_v18  ;;  %v702_v27 = vadd.f32 %v1874_v26, %v663_v19  ;;  %v689_v28 = vadd.f32 %v1874_v26, %v650_v20  ;;  %v1360_v30 = vpop.f32.mrb[8].mxu0  ;;  %v1376_v31 = vpop.f32.mrb[8].mxu1 }
 0x15f   : > { %v705_v29 = vadd.f32 %v1874_v26, %v666_v21  ;;  %v784_v32 = vsel %vm720_vm8, %v688_v14, %v752_v22  ;;  %v648_v34 = vmul.f32 %v1869_v24, %v528_v16  ;;  %v664_v35 = vmul.f32 %v1869_v24, %v592_v17  ;;  %v541_v36 = vpop.f32.mrb[9].mxu0  ;;  %v605_v37 = vpop.f32.mrb[9].mxu1 }
 0x160   : > { %v800_v33 = vsel %vm736_vm9, %v704_v15, %v768_v23  ;;  %vm718_vm10 = vcmp.ge.f32.partialorder %v686_v25, 0.0  ;;  %v750_v38 = vmul.f32 0.2, %v686_v25  ;;  %vm734_vm11 = vcmp.ge.f32.partialorder %v702_v27, 0.0  ;;  %v1361_v46 = vpop.f32.mrb[10].mxu0  ;;  %v1377_v47 = vpop.f32.mrb[10].mxu1 }
 0x161   : > { %v766_v39 = vmul.f32 0.2, %v702_v27  ;;  %vm721_vm12 = vcmp.ge.f32.partialorder %v689_v28, 0.0  ;;  %v753_v40 = vmul.f32 0.2, %v689_v28  ;;  %vm737_vm13 = vcmp.ge.f32.partialorder %v705_v29, 0.0 }
 0x162   : > { %v769_v41 = vmul.f32 0.2, %v705_v29  ;;  %v782_v42 = vsel %vm718_vm10, %v686_v25, %v750_v38  ;;  %v687_v44 = vadd.f32 %v1874_v26, %v648_v34  ;;  %v703_v45 = vadd.f32 %v1874_v26, %v664_v35  ;;  %v544_v52 = vpop.f32.mrb[11].mxu0  ;;  %v608_v53 = vpop.f32.mrb[11].mxu1 }
 0x163   : > { %v798_v43 = vsel %vm734_vm11, %v702_v27, %v766_v39  ;;  %v785_v48 = vsel %vm721_vm12, %v689_v28, %v753_v40  ;;  %v653_v50 = vmul.f32 %v1360_v30, %v1869_v24  ;;  %v669_v51 = vmul.f32 %v1376_v31, %v1869_v24 }
 0x164   : > { %v801_v49 = vsel %vm737_vm13, %v705_v29, %v769_v41  ;;  %v1233_v54 = vpack.c.bf16 %v785_v48, %v784_v32  ;;  %vm719_vm14 = vcmp.ge.f32.partialorder %v687_v44, 0.0  ;;  %v751_v56 = vmul.f32 0.2, %v687_v44 }
 0x165   : > { %v1273_v55 = vpack.c.bf16 %v801_v49, %v800_v33  ;;  %vm735_vm15 = vcmp.ge.f32.partialorder %v703_v45, 0.0  ;;  %v767_v57 = vmul.f32 0.2, %v703_v45  ;;  %v692_v58 = vadd.f32 %v1874_v26, %v653_v50 }
 0x166   : > { %v708_v59 = vadd.f32 %v1874_v26, %v669_v51  ;;  %1297 = vst [vmem:[%s1898_s21 + $0x18] sm:$0xff] %v1233_v54   ;;  %v783_v60 = vsel %vm719_vm14, %v687_v44, %v751_v56  ;;  %v651_v61 = vmul.f32 %v1869_v24, %v541_v36  ;;  %v667_v62 = vmul.f32 %v1869_v24, %v605_v37  ;;  %v1364_v0 = vpop.f32.mrb[12].mxu0  ;;  %v1380_v1 = vpop.f32.mrb[12].mxu1 }
 0x167   : > { %1305 = vst [vmem:[%s1898_s21 + $0x58] sm:$0xff] %v1273_v55   ;;  %v654_v63 = vmul.f32 %v1361_v46, %v1869_v24  ;;  %v1228_v2 = vpack.c.bf16 %v783_v60, %v782_v42  ;;  %v799_v3 = vsel %vm735_vm15, %v703_v45, %v767_v57  ;;  %vm724_vm0 = vcmp.ge.f32.partialorder %v692_v58, 0.0  ;;  %v557_v5 = vpop.f32.mrb[13].mxu0  ;;  %v621_v6 = vpop.f32.mrb[13].mxu1 }
 0x168   : > { %v756_v4 = vmul.f32 0.2, %v692_v58  ;;  %v1268_v7 = vpack.c.bf16 %v799_v3, %v798_v43  ;;  %vm740_vm1 = vcmp.ge.f32.partialorder %v708_v59, 0.0  ;;  %v772_v8 = vmul.f32 0.2, %v708_v59  ;;  %v1365_v10 = vpop.f32.mrb[14].mxu0 }
 0x169   : > { %v690_v9 = vadd.f32 %v1874_v26, %v651_v61  ;;  %v1381_v11 = vpop.f32.mrb[14].mxu1  ;;  %1296 = vst [vmem:[%s1898_s21 + $0x10] sm:$0xff] %v1228_v2   ;;  %v706_v12 = vadd.f32 %v1874_v26, %v667_v62  ;;  %v693_v13 = vadd.f32 %v1874_v26, %v654_v63  ;;  %v670_v14 = vmul.f32 %v1377_v47, %v1869_v24  ;;  %v560_v15 = vpop.f32.mrb[15].mxu0 }
 0x16a   : > { %v624_v16 = vpop.f32.mrb[15].mxu1  ;;  %1304 = vst [vmem:[%s1898_s21 + $0x50] sm:$0xff] %v1268_v7   ;;  %v788_v17 = vsel %vm724_vm0, %v692_v58, %v756_v4  ;;  %v804_v18 = vsel %vm740_vm1, %v708_v59, %v772_v8  ;;  %v652_v19 = vmul.f32 %v1869_v24, %v544_v52  ;;  %v668_v25 = vmul.f32 %v1869_v24, %v608_v53 }
 0x16b   : > { %vm722_vm2 = vcmp.ge.f32.partialorder %v690_v9, 0.0  ;;  %v754_v20 = vmul.f32 0.2, %v690_v9  ;;  %vm725_vm3 = vcmp.ge.f32.partialorder %v693_v13, 0.0  ;;  %v757_v21 = vmul.f32 0.2, %v693_v13 }
 0x16c   : > { %vm738_vm4 = vcmp.ge.f32.partialorder %v706_v12, 0.0  ;;  %v709_v22 = vadd.f32 %v1874_v26, %v670_v14  ;;  %v691_v23 = vadd.f32 %v1874_v26, %v652_v19  ;;  %v770_v27 = vmul.f32 0.2, %v706_v12 }
 0x16d   : > { %v789_v28 = vsel %vm725_vm3, %v693_v13, %v757_v21  ;;  %v657_v29 = vmul.f32 %v1364_v0, %v1869_v24  ;;  %v673_v30 = vmul.f32 %v1380_v1, %v1869_v24  ;;  %v786_v33 = vsel %vm722_vm2, %v690_v9, %v754_v20 }
 0x16e   : > { %v1243_v31 = vpack.c.bf16 %v789_v28, %v788_v17  ;;  %vm741_vm5 = vcmp.ge.f32.partialorder %v709_v22, 0.0  ;;  %v773_v32 = vmul.f32 0.2, %v709_v22  ;;  %vm723_vm6 = vcmp.ge.f32.partialorder %v691_v23, 0.0 }
 0x16f   : > { %v755_v34 = vmul.f32 0.2, %v691_v23  ;;  %v707_v35 = vadd.f32 %v1874_v26, %v668_v25  ;;  %v696_v36 = vadd.f32 %v1874_v26, %v657_v29  ;;  %v712_v38 = vadd.f32 %v1874_v26, %v673_v30 }
 0x170   : > { %1299 = vst [vmem:[%s1898_s21 + $0x28] sm:$0xff] %v1243_v31   ;;  %v805_v37 = vsel %vm741_vm5, %v709_v22, %v773_v32  ;;  %v655_v39 = vmul.f32 %v1869_v24, %v557_v5  ;;  %v658_v40 = vmul.f32 %v1365_v10, %v1869_v24  ;;  %v671_v45 = vmul.f32 %v1869_v24, %v621_v6 }
 0x171   : > { %v1283_v41 = vpack.c.bf16 %v805_v37, %v804_v18  ;;  %v787_v42 = vsel %vm723_vm6, %v691_v23, %v755_v34  ;;  %vm739_vm7 = vcmp.ge.f32.partialorder %v707_v35, 0.0  ;;  %v771_v43 = vmul.f32 0.2, %v707_v35 }
 0x172   : > { %v1238_v44 = vpack.c.bf16 %v787_v42, %v786_v33  ;;  %v802_v46 = vsel %vm738_vm4, %v706_v12, %v770_v27  ;;  %vm728_vm8 = vcmp.ge.f32.partialorder %v696_v36, 0.0  ;;  %v760_v48 = vmul.f32 0.2, %v696_v36 }
 0x173   : > { %1307 = vst [vmem:[%s1898_s21 + $0x68] sm:$0xff] %v1283_v41   ;;  %v803_v47 = vsel %vm739_vm7, %v707_v35, %v771_v43  ;;  %v776_v50 = vmul.f32 0.2, %v712_v38  ;;  %v697_v51 = vadd.f32 %v1874_v26, %v658_v40  ;;  %v674_v52 = vmul.f32 %v1381_v11, %v1869_v24 }
 0x174   : > { %1298 = vst [vmem:[%s1898_s21 + $0x20] sm:$0xff] %v1238_v44   ;;  %v1278_v49 = vpack.c.bf16 %v803_v47, %v802_v46  ;;  %vm744_vm9 = vcmp.ge.f32.partialorder %v712_v38, 0.0  ;;  %v694_v53 = vadd.f32 %v1874_v26, %v655_v39  ;;  %v710_v54 = vadd.f32 %v1874_v26, %v671_v45 }
 0x175   : > { %vm729_vm10 = vcmp.ge.f32.partialorder %v697_v51, 0.0  ;;  %v761_v55 = vmul.f32 0.2, %v697_v51  ;;  %v713_v56 = vadd.f32 %v1874_v26, %v674_v52  ;;  %v792_v57 = vsel %vm728_vm8, %v696_v36, %v760_v48 }
 0x176   : > { %1306 = vst [vmem:[%s1898_s21 + $0x60] sm:$0xff] %v1278_v49   ;;  %v656_v58 = vmul.f32 %v1869_v24, %v560_v15  ;;  %v672_v59 = vmul.f32 %v1869_v24, %v624_v16  ;;  %v808_v60 = vsel %vm744_vm9, %v712_v38, %v776_v50  ;;  %v758_v63 = vmul.f32 0.2, %v694_v53 }
 0x177   : > { %v793_v61 = vsel %vm729_vm10, %v697_v51, %v761_v55  ;;  %vm745_vm11 = vcmp.ge.f32.partialorder %v713_v56, 0.0  ;;  %v777_v62 = vmul.f32 0.2, %v713_v56  ;;  %vm726_vm12 = vcmp.ge.f32.partialorder %v694_v53, 0.0 }
 0x178   : > { %v1253_v0 = vpack.c.bf16 %v793_v61, %v792_v57  ;;  %v695_v1 = vadd.f32 %v1874_v26, %v656_v58  ;;  %v711_v2 = vadd.f32 %v1874_v26, %v672_v59  ;;  %vm742_vm13 = vcmp.ge.f32.partialorder %v710_v54, 0.0 }
 0x179   : > { %v774_v3 = vmul.f32 0.2, %v710_v54  ;;  %v809_v4 = vsel %vm745_vm11, %v713_v56, %v777_v62  ;;  %v790_v7 = vsel %vm726_vm12, %v694_v53, %v758_v63 }
 0x17a   : > { %1301 = vst [vmem:[%s1898_s21 + $0x38] sm:$0xff] %v1253_v0   ;;  %v1293_v5 = vpack.c.bf16 %v809_v4, %v808_v60  ;;  %vm727_vm14 = vcmp.ge.f32.partialorder %v695_v1, 0.0  ;;  %v759_v24 = vmul.f32 0.2, %v695_v1  ;;  %vm743_vm15 = vcmp.ge.f32.partialorder %v711_v2, 0.0 }
 0x17b   : > { %v775_v6 = vmul.f32 0.2, %v711_v2  ;;  %v806_v26 = vsel %vm742_vm13, %v710_v54, %v774_v3 }
 0x17c   : > { %1309 = vst [vmem:[%s1898_s21 + $0x78] sm:$0xff] %v1293_v5   ;;  %v791_v8 = vsel %vm727_vm14, %v695_v1, %v759_v24 }
 0x17d   : > { %v1248_v9 = vpack.c.bf16 %v791_v8, %v790_v7  ;;  %v807_v10 = vsel %vm743_vm15, %v711_v2, %v775_v6 }
 0x17e   : > { %v1288_v11 = vpack.c.bf16 %v807_v10, %v806_v26 }
 0x17f   : > { %1300 = vst [vmem:[%s1898_s21 + $0x30] sm:$0xff] %v1248_v9  }
 0x180   : > { %1308 = vst [vmem:[%s1898_s21 + $0x70] sm:$0xff] %v1288_v11  }
 0x181   : > { %1570 = shalt.err (!%p1567_p5)
}
 0x182   : > { %s1571_s8 = scalar_lea.hbm %s1966_s9, 2048  ;;  %s1575_s27 = scalar_lea.hbm %s2022_s4, 16384 }
 0x183   : > { %p1572_p9 = scmp.ne.s32.totalorder %s1966_s9, %s1571_s8  ;;  %p1576_p3 = scmp.lt.u32.totalorder %s1966_s9, %s2022_s4 }
 0x184   : > { %p1577_p7 = scmp.lt.u32.totalorder %s1575_s27, %s1571_s8  ;;  %p1579_p4 = scmp.lt.u32.totalorder %s1571_s8, %s1966_s9 }
 0x185   : > { %p1573_p1 = pnand %p1572_p9, %p1775_p11 }
 0x186   : > { %p1578_p13 = por %p1577_p7, %p1576_p3 }
 0x187   : > { %p1574_p2 = pneg %p1573_p1 }
 0x188   : > { %p1580_p6 = por %p1579_p4, %p1578_p13 }
 0x18a   : > { %p1581_p8 = pnand %p1580_p6, %p1574_p2 }
 0x18c   : > { %1584 = shalt.err (!%p1581_p8)
}
 0x18d   : > { %s1650_s22 = smov 64   ;;  %s1651_s6 = smov 4  }
 0x18e   : > { %1404 = dma.vmem_to_hbm [thread:$0]  (%p1775_p11), %s1968_s28, 2048, %s1966_s9, %s971_s18, %s1650_s22, %s1650_s22, %s1651_s6  }
 0x18f PF: > { %p1421_p12 = scmp.ge.s32.totalorder %s1643_s20, 2  ;;  %s1000_s29 = sand.u32 1, %s1623_s15  }
 0x190   : > { %p2040_p10 = scmp.ne.s32.totalorder %s2030_s26, 0  ;;  %s1001_s11 = scalar_lea.sflag [#allocation4], %s1000_s29 }
 0x192   : > { %p1415_p0 = pnand %p1421_p12, %p2040_p10 }
 0x194   : > { %1618 = dma.done.wait (!%p1415_p0), %s1001_s11, 2048  }
 0x195   : > { %1620 = vsyncadd (!%p1415_p0), %s1001_s11, 4294965248  ;;  %s21_s20 = sadd.s32 1, %s1643_s20   ;;  %s2041_s15 = smov %s1627_s16 }
 0x196   : > { %p18_p5 = scmp.ge.s32.totalorder %s21_s20, 10   ;;  %s2042_s16 = smov %s1631_s17 }
 0x197   : > { %s2043_s17 = smov %s1784_s10  ;;  %s2044_s18 = smov %s1639_s19 }
 0x198   : > { %s2045_s19 = smov %s2047_s5  ;;  %20 = sbr.rel (!%p18_p5) target bundleno = 7 (0x7), region = 92 }
 0x19f   :  { %1006 = vsyncpa [#allocation3], 1 }
 0x1a0   :  { %1008 = vsyncpa [#allocation3 + $0x1], 1 }
 0x1a1   :  { %1009 = vsyncpa [#allocation6], 1 }
 0x1a2   :  { %1010 = vsyncpa [#allocation4], 1 }
 0x1a3   :  { %1012 = vsyncpa [#allocation4 + $0x1], 1 }

</bundles_post_ra>
